<compile_context>
chip_gen: v6e
topology: v6e:2x2x1
jax: 0.10.0
libtpu: 0.0.40
codegen_flags: <defaults>
</compile_context>

<pallas_src>
import functools
import math

import jax
import jax.numpy as jnp
from jax.experimental import pallas as pl
from jax.experimental.pallas import tpu as pltpu


MXU_DTYPE = jnp.bfloat16      # matmul-operand dtype (jnp.float32 for exact parity)
LSTM_T_CHUNK = 8              # timesteps per grid iteration in the recurrence
LSTM_UNROLL = 2               # fori_loop unroll inside a chunk (review: 2-4, not full)
LINEAR_TILE_N = 1024          # max row tile for the batched linear kernels
LINEAR_TILE_O = 1024          # max output-column tile for the batched linear kernels
VMEM_LIMIT = 32 * 1024 * 1024  # explicit scoped-VMEM limit (safe on v5e/v6e/v7x)


def _round_up(x, m):
    return ((x + m - 1) // m) * m


# ---------------------------------------------------------------------------
# Generic tiled linear:  out = x @ w_t + b     (x:(N,K), w_t:(K,O), b:(1,O))
# Used for both the hoisted LSTM input projection and the decoder.
# ---------------------------------------------------------------------------
def _linear_kernel(x_ref, w_ref, b_ref, o_ref):
    o_ref[...] = (
        jnp.dot(x_ref[...], w_ref[...], preferred_element_type=jnp.float32)
        + b_ref[...]
    ).astype(o_ref.dtype)


def linear_forward(x2d, w_t, b):
    """x2d: (N, K). w_t: (K, O). b: (1, O) float32. Returns (N, O) float32."""
    N, K = x2d.shape
    O = w_t.shape[1]
    # Large row tile: at PTB sizes (N ~ 700) the decoder runs with a single
    # row tile, so the (H x ntoken) weight is streamed from HBM only once.
    tn = min(LINEAR_TILE_N, N)
    to = min(LINEAR_TILE_O, O)
    grid = (pl.cdiv(N, tn), pl.cdiv(O, to))

    return pl.pallas_call(
        _linear_kernel,
        out_shape=jax.ShapeDtypeStruct((N, O), jnp.float32),
        grid_spec=pltpu.PrefetchScalarGridSpec(
            num_scalar_prefetch=0,
            grid=grid,
            in_specs=[
                pl.BlockSpec((tn, K), lambda i, j: (i, 0)),   # activations tile
                pl.BlockSpec((K, to), lambda i, j: (0, j)),   # weight tile (K whole)
                pl.BlockSpec((1, to), lambda i, j: (0, j)),   # bias tile
            ],
            out_specs=pl.BlockSpec((tn, to), lambda i, j: (i, j)),
        ),
        compiler_params=pltpu.CompilerParams(
            dimension_semantics=("parallel", "parallel"),
            vmem_limit_bytes=VMEM_LIMIT),
    )(x2d, w_t, b)


# ---------------------------------------------------------------------------
# LSTM recurrence: per grid step, run LSTM_T_CHUNK timesteps of
#   gates = gates_x[t] + h @ Wh^T ; gate nonlinearities ; update (h, c)
# gates_x is precomputed (x @ Wx^T + b) outside the serial loop.
# ---------------------------------------------------------------------------
def _lstm_chunk_kernel(gx_ref, wh_hbm_ref, hseq_ref, hlast_ref, clast_ref,
                       wh_sc, h_sc, c_sc, wh_sem, *,
                       hidden_sz, hidden_pad, t_chunk, seq_len, mxu_dtype):
    chunk = pl.program_id(0)
    nchunks = pl.num_programs(0)
    HS, HP = hidden_sz, hidden_pad
    needs_tail_mask = (seq_len % t_chunk) != 0   # static python bool

    @pl.when(chunk == 0)
    def _():
        # Single-buffered Wh^T: DMA once from HBM into a persistent VMEM
        # scratch (avoids the pipeline's second useless 4HP*H buffer).
        cp = pltpu.make_async_copy(wh_hbm_ref, wh_sc, wh_sem)
        cp.start()
        cp.wait()
        h_sc[...] = jnp.zeros_like(h_sc)
        c_sc[...] = jnp.zeros_like(c_sc)

    def step(i, carry):
        h_prev = h_sc[...].astype(mxu_dtype)
        gx_t = gx_ref[i]                                   # (bs, 4*HP) f32
        # Gate dots issued per pair (i,f) / (g,o): each MXU call uses a
        # 2*HP-wide weight slab (multiple of 256 lanes on padded HP) and its
        # f32 result stays in vregs; each pair's EUP work overlaps the other
        # pair's MXU weight streaming.
        g_if = gx_t[:, :2 * HP] + jnp.dot(
            h_prev, wh_sc[:, :2 * HP], preferred_element_type=jnp.float32)
        i_t = jax.nn.sigmoid(g_if[:, 0:HS])
        f_t = jax.nn.sigmoid(g_if[:, HP:HP + HS])
        g_go = gx_t[:, 2 * HP:] + jnp.dot(
            h_prev, wh_sc[:, 2 * HP:], preferred_element_type=jnp.float32)
        g_t = jnp.tanh(g_go[:, 0:HS])
        o_t = jax.nn.sigmoid(g_go[:, HP:HP + HS])

        c_new = f_t * c_sc[...] + i_t * g_t
        h_new = o_t * jnp.tanh(c_new)

        if needs_tail_mask:
            # seq was padded up to a chunk multiple; don't let padded steps
            # corrupt the final (h, c) state.
            @pl.when(chunk * t_chunk + i < seq_len)
            def _():
                c_sc[...] = c_new
                h_sc[...] = h_new
        else:
            c_sc[...] = c_new
            h_sc[...] = h_new
        hseq_ref[i] = h_new.astype(hseq_ref.dtype)
        return carry

    jax.lax.fori_loop(0, t_chunk, step, 0, unroll=LSTM_UNROLL)

    # Final (h, c) written only once, on the last chunk.
    @pl.when(chunk == nchunks - 1)
    def _():
        hlast_ref[0] = h_sc[...]
        clast_ref[0] = c_sc[...]


def lstm_forward(gates_x, wh_t_packed, *, hidden_sz, hidden_pad, seq_len,
                 hseq_dtype):
    """gates_x: (seq_pad, bs, 4*H_pad) f32, seq_pad multiple of LSTM_T_CHUNK.
    wh_t_packed: (H, 4*H_pad) in MXU dtype."""
    seq_pad, bs, _ = gates_x.shape
    H, HP = hidden_sz, hidden_pad
    t_chunk = LSTM_T_CHUNK
    assert seq_pad % t_chunk == 0

    out_shapes = (
        jax.ShapeDtypeStruct((seq_pad, bs, H), hseq_dtype),   # hidden_seq (bf16)
        jax.ShapeDtypeStruct((1, bs, H), jnp.float32),        # final h
        jax.ShapeDtypeStruct((1, bs, H), jnp.float32),        # final c
    )

    grid_spec = pltpu.PrefetchScalarGridSpec(
        num_scalar_prefetch=0,
        grid=(seq_pad // t_chunk,),
        in_specs=[
            pl.BlockSpec((t_chunk, bs, 4 * HP), lambda c: (c, 0, 0)),  # gates_x chunk
            pl.BlockSpec(memory_space=pl.ANY),                         # Wh^T stays in HBM
        ],
        out_specs=[
            pl.BlockSpec((t_chunk, bs, H), lambda c: (c, 0, 0)),       # hidden_seq chunk
            pl.BlockSpec((1, bs, H), lambda c: (0, 0, 0)),             # final h
            pl.BlockSpec((1, bs, H), lambda c: (0, 0, 0)),             # final c
        ],
        scratch_shapes=[
            pltpu.VMEM((H, 4 * HP), wh_t_packed.dtype),  # resident Wh^T (single copy)
            pltpu.VMEM((bs, H), jnp.float32),            # h state
            pltpu.VMEM((bs, H), jnp.float32),            # c state
            pltpu.SemaphoreType.DMA(()),                 # Wh^T load semaphore
        ],
    )

    return pl.pallas_call(
        functools.partial(_lstm_chunk_kernel, hidden_sz=H, hidden_pad=HP,
                          t_chunk=t_chunk, seq_len=seq_len,
                          mxu_dtype=wh_t_packed.dtype),
        out_shape=out_shapes,
        grid_spec=grid_spec,
        compiler_params=pltpu.CompilerParams(
            dimension_semantics=("arbitrary",),          # serial recurrence
            vmem_limit_bytes=VMEM_LIMIT),
    )(gates_x, wh_t_packed)


# ---------------------------------------------------------------------------
# Weight packing: (4H, in) torch-Linear layout -> (in, 4*H_pad), with each
# gate block zero-padded to a 128-lane multiple (lane-aligned gate slices).
# Gate order [i, f, g, o] is preserved from the PyTorch layout.
# ---------------------------------------------------------------------------
def _pack_gate_weight_t(w, hidden_sz, hidden_pad, dtype):
    in_dim = w.shape[1]
    w4 = w.reshape(4, hidden_sz, in_dim)
    w4 = jnp.pad(w4, ((0, 0), (0, hidden_pad - hidden_sz), (0, 0)))
    return jnp.transpose(w4, (2, 0, 1)).reshape(in_dim, 4 * hidden_pad).astype(dtype)


def _pack_gate_bias(b, hidden_sz, hidden_pad):
    b4 = b.reshape(4, hidden_sz)
    b4 = jnp.pad(b4, ((0, 0), (0, hidden_pad - hidden_sz)))
    return b4.reshape(1, 4 * hidden_pad).astype(jnp.float32)


# ---------------------------------------------------------------------------
# Full forward (mirrors PTB_LSTM.forward, eval-mode dropout)
# ---------------------------------------------------------------------------
def ptb_lstm_forward(emb, params, *, mxu_dtype=MXU_DTYPE):
    """emb: (seq, bs, ninp) float32. Returns (decoded, (h_t, c_t))."""
    seq, bs, ninp = emb.shape
    H = params["wh"].shape[1]
    HP = _round_up(H, 128)

    # -- stage 1: input projection for all timesteps (one big tiled matmul) --
    wx_t = _pack_gate_weight_t(params["wx"], H, HP, mxu_dtype)      # (ninp, 4*HP)
    bx = _pack_gate_bias(params["bx"], H, HP)                       # (1, 4*HP)
    x_flat = emb.reshape(seq * bs, ninp).astype(mxu_dtype)
    gates_x = linear_forward(x_flat, wx_t, bx).reshape(seq, bs, 4 * HP)

    # Pad seq up to a chunk multiple so the recurrence always runs chunked
    # (padded tail steps are masked inside the kernel).
    seq_pad = _round_up(seq, LSTM_T_CHUNK)
    if seq_pad != seq:
        gates_x = jnp.pad(gates_x, ((0, seq_pad - seq), (0, 0), (0, 0)))

    # -- stage 2: serial recurrence (only h @ Wh^T per step) --
    wh_t = _pack_gate_weight_t(params["wh"], H, HP, mxu_dtype)      # (H, 4*HP)
    hidden_seq, h_t, c_t = lstm_forward(
        gates_x, wh_t, hidden_sz=H, hidden_pad=HP, seq_len=seq,
        hseq_dtype=mxu_dtype)
    hidden_seq = hidden_seq[:seq]                                   # drop pad rows

    # -- stage 3: dropout (eval == identity) + tiled decoder --
    out_flat = hidden_seq.reshape(seq * bs, H)                      # already MXU dtype
    wd_t = params["wd"].T.astype(mxu_dtype)                         # (H, ntoken)
    bd = params["bd"].reshape(1, -1).astype(jnp.float32)            # (1, ntoken)
    decoded = linear_forward(out_flat, wd_t, bd).reshape(seq, bs, -1)
    return decoded, (h_t, c_t)


# ---------------------------------------------------------------------------
# Deterministic parameter init (matches module's __init__ shapes)
# ---------------------------------------------------------------------------
def init_params(key, ntoken, ninp, nhid):
    stdv = 1.0 / math.sqrt(nhid)
    k = jax.random.split(key, 5)
    params = {
        # LSTM: W = Linear(ninp, 4*nhid) -> weight (4H, ninp), bias (4H,)
        "wx": jax.random.uniform(k[0], (4 * nhid, ninp), jnp.float32, -stdv, stdv),
        "bx": jax.random.uniform(k[1], (4 * nhid,), jnp.float32, -stdv, stdv),
        # U = Linear(nhid, 4*nhid, bias=False) -> weight (4H, H)
        "wh": jax.random.uniform(k[2], (4 * nhid, nhid), jnp.float32, -stdv, stdv),
        # decoder = Linear(nhid, ntoken) -> weight (ntoken, H), bias (ntoken,)
        "wd": jax.random.uniform(k[3], (ntoken, nhid), jnp.float32, -stdv, stdv),
        "bd": jax.random.uniform(k[4], (ntoken,), jnp.float32, -stdv, stdv),
    }
    return params


# ---------------------------------------------------------------------------
# Pure-JAX f32 reference (mirrors the PyTorch forward) for a sanity check
# ---------------------------------------------------------------------------
def _reference_forward(emb, params):
    seq, bs, _ = emb.shape
    H = params["wh"].shape[1]
    h = jnp.zeros((bs, H), jnp.float32)
    c = jnp.zeros((bs, H), jnp.float32)
    hs = []
    for t in range(seq):
        gates = emb[t] @ params["wx"].T + params["bx"] + h @ params["wh"].T
        i_t = jax.nn.sigmoid(gates[:, :H])
        f_t = jax.nn.sigmoid(gates[:, H:2 * H])
        g_t = jnp.tanh(gates[:, 2 * H:3 * H])
        o_t = jax.nn.sigmoid(gates[:, 3 * H:])
        c = f_t * c + i_t * g_t
        h = o_t * jnp.tanh(c)
        hs.append(h)
    hseq = jnp.stack(hs, axis=0)
    decoded = hseq.reshape(seq * bs, H) @ params["wd"].T + params["bd"]
    return decoded.reshape(seq, bs, -1), (h[None], c[None])


# ---------------------------------------------------------------------------
if __name__ == "__main__":
    SEQ, BS, NINP, NHID, NTOKEN = 8, 4, 16, 32, 24

    key = jax.random.PRNGKey(0)
    pkey, xkey = jax.random.split(key)
    params = init_params(pkey, NTOKEN, NINP, NHID)
    emb = jax.random.normal(xkey, (SEQ, BS, NINP), jnp.float32)

    decoded, (h_t, c_t) = ptb_lstm_forward(emb, params)
    jax.block_until_ready((decoded, h_t, c_t))

    assert decoded.shape == (SEQ, BS, NTOKEN)
    assert h_t.shape == (1, BS, NHID) and c_t.shape == (1, BS, NHID)

    # Loose-tolerance check against the f32 reference (MXU operands are bf16).
    ref_dec, (ref_h, ref_c) = _reference_forward(emb, params)
    assert jnp.allclose(decoded, ref_dec, atol=5e-2, rtol=5e-2)
    assert jnp.allclose(h_t, ref_h, atol=5e-2, rtol=5e-2)
    assert jnp.allclose(c_t, ref_c, atol=5e-2, rtol=5e-2)

    print("KERNEL_OK")
</pallas_src>

<mosaic_0001>
module attributes {stable_mosaic.version = 11 : i64} {
  func.func @_linear_kernel(%arg0: i32, %arg1: i32, %arg2: memref<32x16xbf16, #tpu.memory_space<vmem>>, %arg3: memref<16x512xbf16, #tpu.memory_space<vmem>>, %arg4: memref<1x512xf32, #tpu.memory_space<vmem>>, %arg5: memref<32x512xf32, #tpu.memory_space<vmem>>) attributes {dimension_semantics = [#tpu.dimension_semantics<parallel>, #tpu.dimension_semantics<parallel>], iteration_bounds = array<i64: 1, 1>, scalar_prefetch = 0 : i64, scratch_operands = 0 : i64, tpu.core_type = #tpu.core_type<tc>, window_params = [{transform_indices = @transform_0, window_bounds = array<i64: 32, 16>}, {transform_indices = @transform_1, window_bounds = array<i64: 16, 512>}, {transform_indices = @transform_2, window_bounds = array<i64: 1, 512>}, {transform_indices = @transform_3, window_bounds = array<i64: 32, 512>}]} {
    %c0 = arith.constant 0 : index
    %c0_0 = arith.constant 0 : index
    %0 = vector.load %arg2[%c0, %c0_0] : memref<32x16xbf16, #tpu.memory_space<vmem>>, vector<32x16xbf16>
    %c0_1 = arith.constant 0 : index
    %c0_2 = arith.constant 0 : index
    %1 = vector.load %arg3[%c0_1, %c0_2] : memref<16x512xbf16, #tpu.memory_space<vmem>>, vector<16x512xbf16>
    %cst = arith.constant dense<0.000000e+00> : vector<32x512xf32>
    %2 = tpu.matmul %0, %1, %cst {dimension_numbers = #tpu.dot_dimension_numbers<[1], [0], [0], [1], [0, 0, 1, 1], [], []>} : vector<32x16xbf16>, vector<16x512xbf16>, vector<32x512xf32> -> vector<32x512xf32>
    %c0_3 = arith.constant 0 : index
    %c0_4 = arith.constant 0 : index
    %3 = vector.load %arg4[%c0_3, %c0_4] : memref<1x512xf32, #tpu.memory_space<vmem>>, vector<1x512xf32>
    %4 = vector.broadcast %3 : vector<1x512xf32> to vector<32x512xf32>
    %5 = arith.addf %2, %4 : vector<32x512xf32>
    %c0_5 = arith.constant 0 : index
    %c0_6 = arith.constant 0 : index
    %6 = vector.load %arg5[%c0_5, %c0_6] : memref<32x512xf32, #tpu.memory_space<vmem>>, vector<32x512xf32>
    tpu.vector_store %arg5[%c0_5, %c0_6], %5 {strides = array<i32>} : memref<32x512xf32, #tpu.memory_space<vmem>>, vector<32x512xf32>,
    return
  }
  func.func @transform_0(%arg0: i32, %arg1: i32) -> (i32, i32) {
    %c0_i32 = arith.constant 0 : i32
    %c0_i32_0 = arith.constant 0 : i32
    return %arg0, %c0_i32 : i32, i32
  }
  func.func @transform_1(%arg0: i32, %arg1: i32) -> (i32, i32) {
    %c0_i32 = arith.constant 0 : i32
    %c0_i32_0 = arith.constant 0 : i32
    return %c0_i32, %arg1 : i32, i32
  }
  func.func @transform_2(%arg0: i32, %arg1: i32) -> (i32, i32) {
    %c0_i32 = arith.constant 0 : i32
    %c0_i32_0 = arith.constant 0 : i32
    return %c0_i32, %arg1 : i32, i32
  }
  func.func @transform_3(%arg0: i32, %arg1: i32) -> (i32, i32) {
    %c0_i32 = arith.constant 0 : i32
    return %arg0, %arg1 : i32, i32
  }
}

</mosaic_0001>

<bundles_post_ra>
// kernel: tpu_custom_call.1
= control target key start
LH: loop header
LB: loop body
LE: loop exit
PB: predicated region body
PF: predicated region fallthrough
CT: control target
= control target key end

     0   :  { %8 = vsyncpa [#allocation3], 0  ;;  %s347_s0 = inlined_call_operand.vmem [shape: bf16[32,16], index: 0, kind: input, shape index: {}]   ;;  %s348_s1 = inlined_call_operand.hbm [shape: bf16[16,512], index: 1, kind: input, shape index: {}]   ;;  %s349_s2 = inlined_call_operand.vmem [shape: f32[1,512], index: 2, kind: input, shape index: {}]   ;;  %s350_s3 = inlined_call_operand.hbm [shape: f32[32,512], index: 3, kind: output, shape index: {}]  }
   0x1   :  { %9 = vsyncpa [#allocation4], 0  ;;  %s305_s12 = smov [#allocation2]  }
   0x2   :  { %s17_s13 = sshll.u32 %s305_s12, 4  ;;  %s18_s13 = int_to_ptr.vmem [resolvable:$true] %s17_s13 }
   0x3   :  { %s269_s14 = scalar_lea.vmem %s18_s13, 512  ;;  %p274_p1 = scmp.lt.s32.totalorder %s18_s13, %s18_s13 }
   0x4   :  { %p270_p0 = scmp.ne.s32.totalorder %s18_s13, %s269_s14  ;;  %p275_p2 = scmp.lt.s32.totalorder %s269_s14, %s269_s14 }
   0x6   :  { %p276_p3 = por %p275_p2, %p274_p1 }
   0x8   :  { %p277_p4 = pnand %p276_p3, %p270_p0 }
   0xa   :  { %280 = shalt.err (!%p277_p4)
}
   0xb   :  { %s306_s15 = smov 256   ;;  %s307_s16 = smov 16  }
   0xc   :  { %23 = dma.hbm_to_vmem [thread:$0]  %s348_s1, 512, %s18_s13, [#allocation3], %s306_s15, %s306_s15, %s307_s16  }
   0xd   :  { %301 = dma.done.wait [#allocation3], 512  }
   0xe   :  { %302 = vsyncadd [#allocation3], 4294966784  ;;  %v308_v0 = vmov 0   ;;  %v253_v1 = vld [vmem:[#allocation2 + $0x4] ss:$16 sps:$4 sm:$0xff]   ;;  %vm90_vm0 = vcmask 130048   ;;  %v40_v7 = vlaneseq }
   0xf   :  { %129 = vmatprep.mubr.bf16.mxu0 %v308_v0  ;;  %182 = vmatprep.mubr.bf16.mxu1 %v308_v0  ;;  %v255_v2 = vld [vmem:[#allocation2 + $0xc] ss:$16 sps:$4 sm:$0xff]   ;;  %v257_v3 = vld [vmem:[#allocation2] ss:$16 sps:$4 sm:$0xff]   ;;  %v258_v4 = vld [vmem:[#allocation2 + $0x8] ss:$16 sps:$4 sm:$0xff]  }
  0x10   :  { %111 = vmatprep.subr.bf16.mxu0 %v253_v1  ;;  %164 = vmatprep.subr.bf16.mxu1 %v255_v2  ;;  %v259_v5 = vld [vmem:[%s347_s0] sm:$0xff]   ;;  %v260_v6 = vld [vmem:[%s347_s0 + $0x8] sm:$0xff]   ;;  %v41_v8 = vshrl.u32 %v40_v7, 7  ;;  %s309_s0 = smov [#allocation5]  }
  0x11   :  { %112 = vmatpush1.bf16.msra.mxu0 %v257_v3  ;;  %165 = vmatpush1.bf16.msra.mxu1 %v258_v4  ;;  %v38_v11 = vld [vmem:[%s349_s2] sm:$0xf]  ;;  %s224_s2 = sshll.u32 %s309_s0, 4  ;;  %s225_s2 = int_to_ptr.vmem [resolvable:$true] %s224_s2 }
  0x12   :  { %v42_v9 = vsub.s32 0, %v41_v8  ;;  %v50_v10 = vsub.s32 2, %v41_v8  ;;  %v46_v12 = vsub.s32 1, %v41_v8  ;;  %v54_v13 = vsub.s32 3, %v41_v8  ;;  %s281_s24 = scalar_lea.vmem %s225_s2, 2048  ;;  %p286_p6 = scmp.lt.s32.totalorder %s225_s2, %s225_s2 }
  0x13   :  { %p282_p5 = scmp.ne.s32.totalorder %s225_s2, %s281_s24  ;;  %p287_p7 = scmp.lt.s32.totalorder %s281_s24, %s281_s24 }
  0x14   :  { %242 = vmatmul.mubr.msk.bf16.vlgmr.msra.gmra.mxu0 %vm90_vm0, %v259_v5  ;;  %244 = vmatmul.mubr.msk.bf16.vlgmr.msra.gmra.mxu1 %vm90_vm0, %v259_v5  ;;  %v43_v14 = vrot.slane %v38_v11, %v42_v9  ;;  %v51_v15 = vrot.slane %v38_v11, %v50_v10  ;;  %v47_v16 = vrot.slane %v38_v11, %v46_v12 }
  0x15   :  { %139 = vmatprep.mubr.bf16.mxu0 %v308_v0  ;;  %192 = vmatprep.mubr.bf16.mxu1 %v308_v0  ;;  %v55_v17 = vrot.slane %v38_v11, %v54_v13  ;;  %p288_p8 = por %p287_p7, %p286_p6 }
  0x17   :  { %p289_p9 = pnand %p288_p8, %p282_p5 }
  0x1c   :  { %243 = vmatmul.mubr.msk.bf16.gmra.mxu0 %vm90_vm0, %v260_v6  ;;  %245 = vmatmul.mubr.msk.bf16.gmra.mxu1 %vm90_vm0, %v260_v6 }
  0xd4   :  { %v131_v18 = vpop.f32.mrf.mxu0  ;;  %v184_v19 = vpop.f32.mrf.mxu1 }
  0xd5   :  { %v132_v20 = vadd.f32 %v131_v18, %v43_v14  ;;  %v185_v21 = vadd.f32 %v184_v19, %v51_v15 }
  0xd6   :  { %v133_v22 = vpop.f32.mrf.mxu0  ;;  %v186_v23 = vpop.f32.mrf.mxu1 }
  0xd7   :  { %203 = vst [vmem:[#allocation5] sm:$0xff] %v132_v20  ;;  %205 = vst [vmem:[#allocation5 + $0x10] sm:$0xff] %v185_v21  ;;  %v134_v24 = vadd.f32 %v133_v22, %v47_v16  ;;  %v187_v25 = vadd.f32 %v186_v23, %v55_v17 }
  0xd8   :  { %v135_v26 = vpop.f32.mrf.mxu0  ;;  %v188_v27 = vpop.f32.mrf.mxu1 }
  0xd9   :  { %204 = vst [vmem:[#allocation5 + $0x8] sm:$0xff] %v134_v24  ;;  %206 = vst [vmem:[#allocation5 + $0x18] sm:$0xff] %v187_v25  ;;  %v136_v28 = vadd.f32 %v135_v26, %v43_v14  ;;  %v189_v29 = vadd.f32 %v188_v27, %v51_v15 }
  0xda   :  { %v137_v30 = vpop.f32.mrf.mxu0  ;;  %v190_v31 = vpop.f32.mrf.mxu1 }
  0xdb   :  { %207 = vst [vmem:[#allocation5 + $0x20] sm:$0xff] %v136_v28  ;;  %209 = vst [vmem:[#allocation5 + $0x30] sm:$0xff] %v189_v29  ;;  %v138_v32 = vadd.f32 %v137_v30, %v47_v16  ;;  %v191_v33 = vadd.f32 %v190_v31, %v55_v17 }
  0xdc   :  { %v141_v34 = vpop.f32.mrf.mxu0  ;;  %v194_v35 = vpop.f32.mrf.mxu1 }
  0xdd   :  { %208 = vst [vmem:[#allocation5 + $0x28] sm:$0xff] %v138_v32  ;;  %210 = vst [vmem:[#allocation5 + $0x38] sm:$0xff] %v191_v33  ;;  %v142_v36 = vadd.f32 %v141_v34, %v43_v14  ;;  %v195_v37 = vadd.f32 %v194_v35, %v51_v15 }
  0xde   :  { %v143_v38 = vpop.f32.mrf.mxu0  ;;  %v196_v39 = vpop.f32.mrf.mxu1 }
  0xdf   :  { %211 = vst [vmem:[#allocation5 + $0x40] sm:$0xff] %v142_v36  ;;  %213 = vst [vmem:[#allocation5 + $0x50] sm:$0xff] %v195_v37  ;;  %v144_v40 = vadd.f32 %v143_v38, %v47_v16  ;;  %v197_v41 = vadd.f32 %v196_v39, %v55_v17 }
  0xe0   :  { %v145_v42 = vpop.f32.mrf.mxu0  ;;  %v198_v43 = vpop.f32.mrf.mxu1 }
  0xe1   :  { %212 = vst [vmem:[#allocation5 + $0x48] sm:$0xff] %v144_v40  ;;  %214 = vst [vmem:[#allocation5 + $0x58] sm:$0xff] %v197_v41  ;;  %v146_v44 = vadd.f32 %v145_v42, %v43_v14  ;;  %v199_v45 = vadd.f32 %v198_v43, %v51_v15 }
  0xe2   :  { %v147_v46 = vpop.f32.mrf.mxu0  ;;  %v200_v47 = vpop.f32.mrf.mxu1 }
  0xe3   :  { %215 = vst [vmem:[#allocation5 + $0x60] sm:$0xff] %v146_v44  ;;  %217 = vst [vmem:[#allocation5 + $0x70] sm:$0xff] %v199_v45  ;;  %v148_v48 = vadd.f32 %v147_v46, %v47_v16  ;;  %v201_v49 = vadd.f32 %v200_v47, %v55_v17 }
  0xe5   :  { %216 = vst [vmem:[#allocation5 + $0x68] sm:$0xff] %v148_v48  ;;  %218 = vst [vmem:[#allocation5 + $0x78] sm:$0xff] %v201_v49 }
  0xe6   :  { %292 = shalt.err (!%p289_p9)
}
  0xe7   :  { %s310_s25 = smov 512   ;;  %s311_s26 = smov 32  }
  0xe8   :  { %230 = dma.vmem_to_hbm [thread:$0]  %s225_s2, 2048, %s350_s3, [#allocation4], %s310_s25, %s310_s25, %s311_s26  }
  0xe9   :  { %303 = dma.done.wait [#allocation4], 2048  }
  0xea   :  { %304 = vsyncadd [#allocation4], 4294965248 }
  0xeb   :  { %234 = vsyncpa [#allocation3], 1 }
  0xec   :  { %235 = vsyncpa [#allocation4], 1 }

</bundles_post_ra>
